<compile_context>
chip_gen: v6e
topology: v6e:2x2x1
jax: 0.10.0
libtpu: 0.0.40
codegen_flags: <defaults>
</compile_context>

<pallas_src>
import functools

import jax
import jax.numpy as jnp
import numpy as np
from jax.experimental import pallas as pl
from jax.experimental.pallas import tpu as pltpu


# ------------------------------ Pallas kernel ------------------------------

def _attnpool_kernel(x_ref, pos0_ref, posr_ref, msel_ref, mexp_ref,
                     wq_ref, bq_ref, wk_ref, bk_ref, wv_ref, bv_ref,
                     wc_ref, bc_ref, o_ref, *, n_head):
    # One batch element per grid step; all math is 2-D and lane-dense over C.
    x = x_ref[0].astype(jnp.float32)                       # (HW, C) spatial tokens
    HW, C = x.shape
    hd = C // n_head
    scale = hd ** -0.5

    # --- fused token build: mean token + positional embedding --------------
    q_tok = jnp.mean(x, axis=0, keepdims=True) + pos0_ref[...]   # (1, C)  query/mean token
    kv_tok = x + posr_ref[...]                                    # (HW, C) spatial tokens + pos

    # --- q/k/v projections: bf16 operands, f32 accumulation (MXU) ----------
    q_b = q_tok.astype(jnp.bfloat16)
    t_b = kv_tok.astype(jnp.bfloat16)
    q = jnp.dot(q_b, wq_ref[...], preferred_element_type=jnp.float32) + bq_ref[...]   # (1, C)
    k0 = jnp.dot(q_b, wk_ref[...], preferred_element_type=jnp.float32) + bk_ref[...]  # (1, C)
    v0 = jnp.dot(q_b, wv_ref[...], preferred_element_type=jnp.float32) + bv_ref[...]  # (1, C)
    k = jnp.dot(t_b, wk_ref[...], preferred_element_type=jnp.float32) + bk_ref[...]   # (HW, C)
    v = jnp.dot(t_b, wv_ref[...], preferred_element_type=jnp.float32) + bv_ref[...]   # (HW, C)

    # --- single-query attention, all heads at once (no python head loop) ---
    q = q * scale                        # fold 1/sqrt(hd) into q (incl. its bias, as torch does)
    msel = msel_ref[...]                 # (C, H): msel[c, h] = 1 iff channel c belongs to head h
    mexp = mexp_ref[...]                 # (H, C) = msel.T

    s = jnp.dot(q * k, msel, preferred_element_type=jnp.float32)    # (HW, H) per-head scores
    s0 = jnp.dot(q * k0, msel, preferred_element_type=jnp.float32)  # (1, H)  score vs mean token

    m = jnp.maximum(jnp.max(s, axis=0, keepdims=True), s0)          # (1, H)  stable-softmax max
    p = jnp.exp(s - m)                                               # (HW, H)
    p0 = jnp.exp(s0 - m)                                             # (1, H)
    inv = pl.reciprocal(jnp.sum(p, axis=0, keepdims=True) + p0, approx=True)   # (1, H)

    # broadcast per-head prob / normalizer across that head's lanes, reduce over tokens
    pexp = jnp.dot(p, mexp, preferred_element_type=jnp.float32)      # (HW, C)
    p0exp = jnp.dot(p0, mexp, preferred_element_type=jnp.float32)    # (1, C)
    invexp = jnp.dot(inv, mexp, preferred_element_type=jnp.float32)  # (1, C)
    attn = (jnp.sum(pexp * v, axis=0, keepdims=True) + p0exp * v0) * invexp    # (1, C)

    # --- output projection ---------------------------------------------------
    out = jnp.dot(attn.astype(jnp.bfloat16), wc_ref[...],
                  preferred_element_type=jnp.float32) + bc_ref[...]  # (1, out_dim)
    o_ref[...] = out.reshape(o_ref.shape)


# --------------------------------- wrapper ---------------------------------

def attention_pool_pallas(params, x):
    B, C, H, W = x.shape
    HW = H * W
    heads = params['heads']
    hd = C // heads
    out_dim = params['wc'].shape[1]

    # NCHW -> (B, HW, C): layout glue equivalent to torch flatten(2).permute(2,0,1)
    # (batch-major instead of sequence-major; same per-token values).
    toks = x.reshape(B, C, HW).transpose(0, 2, 1).astype(jnp.float32)

    pos0 = params['pos'][0:1]            # (1, C)  positional embedding of the mean token
    posr = params['pos'][1:]             # (HW, C) positional embedding of spatial tokens

    # 0/1 head-selector matrices: batch all heads through two tiny matmuls.
    sel = (np.arange(C)[:, None] // hd == np.arange(heads)[None, :]).astype(np.float32)
    msel = jnp.asarray(sel)              # (C, heads)
    mexp = jnp.asarray(sel.T)            # (heads, C)

    # matmul operands in bf16 (f32 accumulation inside the kernel)
    wq = params['wq'].astype(jnp.bfloat16)
    wk = params['wk'].astype(jnp.bfloat16)
    wv = params['wv'].astype(jnp.bfloat16)
    wc = params['wc'].astype(jnp.bfloat16)

    kernel = functools.partial(_attnpool_kernel, n_head=heads)
    out = pl.pallas_call(
        kernel,
        out_shape=jax.ShapeDtypeStruct((B, 1, out_dim), jnp.float32),
        grid_spec=pltpu.PrefetchScalarGridSpec(
            num_scalar_prefetch=0,
            grid=(B,),
            in_specs=[
                pl.BlockSpec((1, HW, C), lambda b: (b, 0, 0)),   # tokens: streamed per batch element
                pl.BlockSpec((1, C), lambda b: (0, 0)),          # pos[0]   (VMEM-resident)
                pl.BlockSpec((HW, C), lambda b: (0, 0)),         # pos[1:]  (VMEM-resident)
                pl.BlockSpec((C, heads), lambda b: (0, 0)),      # head selector (resident)
                pl.BlockSpec((heads, C), lambda b: (0, 0)),      # head expander (resident)
                pl.BlockSpec((C, C), lambda b: (0, 0)),          # wq
                pl.BlockSpec((1, C), lambda b: (0, 0)),          # bq
                pl.BlockSpec((C, C), lambda b: (0, 0)),          # wk
                pl.BlockSpec((1, C), lambda b: (0, 0)),          # bk
                pl.BlockSpec((C, C), lambda b: (0, 0)),          # wv
                pl.BlockSpec((1, C), lambda b: (0, 0)),          # bv
                pl.BlockSpec((C, out_dim), lambda b: (0, 0)),    # wc
                pl.BlockSpec((1, out_dim), lambda b: (0, 0)),    # bc
            ],
            out_specs=pl.BlockSpec((1, 1, out_dim), lambda b: (b, 0, 0)),
        ),
        compiler_params=pltpu.CompilerParams(
            dimension_semantics=("parallel",),        # megacore sharding on v7x; no-op on v5e/v6e
            vmem_limit_bytes=32 * 1024 * 1024,
        ),
    )(toks, pos0, posr, msel, mexp, wq, params['bq'], wk, params['bk'],
      wv, params['bv'], wc, params['bc'])
    return out.reshape(B, out_dim)


# ------------------------- parameters (synthetic) ---------------------------

def init_params(key, *, spacial_dim, embed_dim, num_heads, output_dim):
    assert embed_dim % num_heads == 0
    S = spacial_dim * spacial_dim + 1
    ks = jax.random.split(key, 9)
    w = 0.05
    return dict(
        heads=num_heads,
        # torch: randn(S, E) / E**0.5
        pos=jax.random.normal(ks[0], (S, embed_dim), jnp.float32) / (embed_dim ** 0.5),
        # nn.Linear weights stored transposed (in, out) so y = x @ w + b
        wq=w * jax.random.normal(ks[1], (embed_dim, embed_dim), jnp.float32),
        bq=w * jax.random.normal(ks[2], (1, embed_dim), jnp.float32),
        wk=w * jax.random.normal(ks[3], (embed_dim, embed_dim), jnp.float32),
        bk=w * jax.random.normal(ks[4], (1, embed_dim), jnp.float32),
        wv=w * jax.random.normal(ks[5], (embed_dim, embed_dim), jnp.float32),
        bv=w * jax.random.normal(ks[6], (1, embed_dim), jnp.float32),
        wc=w * jax.random.normal(ks[7], (embed_dim, output_dim), jnp.float32),
        bc=w * jax.random.normal(ks[8], (1, output_dim), jnp.float32),
    )


# ---------------------------- pure-JAX reference ----------------------------

def attention_pool_reference(params, x):
    B, C, H, W = x.shape
    HW = H * W
    heads = params['heads']
    hd = C // heads
    toks = x.reshape(B, C, HW).transpose(0, 2, 1).astype(jnp.float32)       # (B, HW, C)
    full = jnp.concatenate([jnp.mean(toks, axis=1, keepdims=True), toks], axis=1)
    full = full + params['pos'][None]                                        # (B, S, C)
    S = HW + 1
    q = full[:, :1, :] @ params['wq'] + params['bq']                         # (B, 1, C)
    k = full @ params['wk'] + params['bk']                                   # (B, S, C)
    v = full @ params['wv'] + params['bv']
    qh = q.reshape(B, 1, heads, hd).transpose(0, 2, 1, 3)                    # (B, H, 1, hd)
    kh = k.reshape(B, S, heads, hd).transpose(0, 2, 1, 3)                    # (B, H, S, hd)
    vh = v.reshape(B, S, heads, hd).transpose(0, 2, 1, 3)
    s = jnp.einsum('bhqd,bhkd->bhqk', qh, kh) / jnp.sqrt(jnp.float32(hd))
    p = jax.nn.softmax(s, axis=-1)
    o = jnp.einsum('bhqk,bhkd->bhqd', p, vh)                                 # (B, H, 1, hd)
    o = o.transpose(0, 2, 1, 3).reshape(B, C)
    return o @ params['wc'] + params['bc']                                   # (B, out_dim)


# ------------------------------------ main -----------------------------------

if __name__ == "__main__":
    key = jax.random.PRNGKey(0)
    kp, kx = jax.random.split(key)

    # small but lane-dense shapes: 8x8 spatial grid (65 tokens with the mean token),
    # embed_dim=128, 4 heads (head_dim 32), output_dim=128, batch=2
    spacial_dim, embed_dim, num_heads, output_dim, batch = 8, 128, 4, 128, 2

    params = init_params(kp, spacial_dim=spacial_dim, embed_dim=embed_dim,
                         num_heads=num_heads, output_dim=output_dim)
    x = jax.random.normal(kx, (batch, embed_dim, spacial_dim, spacial_dim), jnp.float32)

    out = jax.block_until_ready(attention_pool_pallas(params, x))
    ref = jax.block_until_ready(attention_pool_reference(params, x))

    assert out.shape == (batch, output_dim) and out.dtype == jnp.float32
    np.testing.assert_allclose(np.asarray(out), np.asarray(ref), atol=2e-2, rtol=2e-2)
    print("KERNEL_OK")
</pallas_src>

<mosaic_0001>
module attributes {stable_mosaic.version = 11 : i64} {
  func.func @_attnpool_kernel(%arg0: i32, %arg1: memref<1x64x128xf32, #tpu.memory_space<vmem>>, %arg2: memref<1x128xf32, #tpu.memory_space<vmem>>, %arg3: memref<64x128xf32, #tpu.memory_space<vmem>>, %arg4: memref<128x4xf32, #tpu.memory_space<vmem>>, %arg5: memref<4x128xf32, #tpu.memory_space<vmem>>, %arg6: memref<128x128xbf16, #tpu.memory_space<vmem>>, %arg7: memref<1x128xf32, #tpu.memory_space<vmem>>, %arg8: memref<128x128xbf16, #tpu.memory_space<vmem>>, %arg9: memref<1x128xf32, #tpu.memory_space<vmem>>, %arg10: memref<128x128xbf16, #tpu.memory_space<vmem>>, %arg11: memref<1x128xf32, #tpu.memory_space<vmem>>, %arg12: memref<128x128xbf16, #tpu.memory_space<vmem>>, %arg13: memref<1x128xf32, #tpu.memory_space<vmem>>, %arg14: memref<1x1x128xf32, #tpu.memory_space<vmem>>) attributes {dimension_semantics = [#tpu.dimension_semantics<parallel>], iteration_bounds = array<i64: 2>, scalar_prefetch = 0 : i64, scratch_operands = 0 : i64, tpu.core_type = #tpu.core_type<tc>, window_params = [{transform_indices = @transform_0, window_bounds = array<i64: 1, 64, 128>}, {pipeline_mode = #tpu.pipeline_mode<synchronous>, transform_indices = @transform_1, window_bounds = array<i64: 1, 128>}, {pipeline_mode = #tpu.pipeline_mode<synchronous>, transform_indices = @transform_2, window_bounds = array<i64: 64, 128>}, {pipeline_mode = #tpu.pipeline_mode<synchronous>, transform_indices = @transform_3, window_bounds = array<i64: 128, 4>}, {pipeline_mode = #tpu.pipeline_mode<synchronous>, transform_indices = @transform_4, window_bounds = array<i64: 4, 128>}, {pipeline_mode = #tpu.pipeline_mode<synchronous>, transform_indices = @transform_5, window_bounds = array<i64: 128, 128>}, {pipeline_mode = #tpu.pipeline_mode<synchronous>, transform_indices = @transform_6, window_bounds = array<i64: 1, 128>}, {pipeline_mode = #tpu.pipeline_mode<synchronous>, transform_indices = @transform_7, window_bounds = array<i64: 128, 128>}, {pipeline_mode = #tpu.pipeline_mode<synchronous>, transform_indices = @transform_8, window_bounds = array<i64: 1, 128>}, {pipeline_mode = #tpu.pipeline_mode<synchronous>, transform_indices = @transform_9, window_bounds = array<i64: 128, 128>}, {pipeline_mode = #tpu.pipeline_mode<synchronous>, transform_indices = @transform_10, window_bounds = array<i64: 1, 128>}, {pipeline_mode = #tpu.pipeline_mode<synchronous>, transform_indices = @transform_11, window_bounds = array<i64: 128, 128>}, {pipeline_mode = #tpu.pipeline_mode<synchronous>, transform_indices = @transform_12, window_bounds = array<i64: 1, 128>}, {transform_indices = @transform_13, window_bounds = array<i64: 1, 1, 128>}]} {
    %c0 = arith.constant 0 : index
    %c0_0 = arith.constant 0 : index
    %c0_1 = arith.constant 0 : index
    %0 = vector.load %arg1[%c0, %c0_0, %c0_1] : memref<1x64x128xf32, #tpu.memory_space<vmem>>, vector<1x64x128xf32>
    %1 = vector.shape_cast %0 : vector<1x64x128xf32> to vector<64x128xf32>
    %cst = arith.constant dense<0.000000e+00> : vector<128xf32>
    %2 = vector.multi_reduction <add>, %1, %cst [0] : vector<64x128xf32> to vector<128xf32>
    %3 = vector.shape_cast %2 : vector<128xf32> to vector<1x128xf32>
    %cst_2 = arith.constant 6.400000e+01 : f32
    %4 = vector.broadcast %cst_2 : f32 to vector<1x128xf32>
    %5 = arith.divf %3, %4 : vector<1x128xf32>
    %c0_3 = arith.constant 0 : index
    %c0_4 = arith.constant 0 : index
    %6 = vector.load %arg2[%c0_3, %c0_4] : memref<1x128xf32, #tpu.memory_space<vmem>>, vector<1x128xf32>
    %7 = arith.addf %5, %6 : vector<1x128xf32>
    %c0_5 = arith.constant 0 : index
    %c0_6 = arith.constant 0 : index
    %8 = vector.load %arg3[%c0_5, %c0_6] : memref<64x128xf32, #tpu.memory_space<vmem>>, vector<64x128xf32>
    %9 = arith.addf %1, %8 : vector<64x128xf32>
    %10 = arith.truncf %7 : vector<1x128xf32> to vector<1x128xbf16>
    %11 = arith.truncf %9 : vector<64x128xf32> to vector<64x128xbf16>
    %c0_7 = arith.constant 0 : index
    %c0_8 = arith.constant 0 : index
    %12 = vector.load %arg6[%c0_7, %c0_8] : memref<128x128xbf16, #tpu.memory_space<vmem>>, vector<128x128xbf16>
    %cst_9 = arith.constant dense<0.000000e+00> : vector<1x128xf32>
    %13 = tpu.matmul %10, %12, %cst_9 {dimension_numbers = #tpu.dot_dimension_numbers<[1], [0], [0], [1], [0, 0, 1, 1], [], []>} : vector<1x128xbf16>, vector<128x128xbf16>, vector<1x128xf32> -> vector<1x128xf32>
    %c0_10 = arith.constant 0 : index
    %c0_11 = arith.constant 0 : index
    %14 = vector.load %arg7[%c0_10, %c0_11] : memref<1x128xf32, #tpu.memory_space<vmem>>, vector<1x128xf32>
    %15 = arith.addf %13, %14 : vector<1x128xf32>
    %c0_12 = arith.constant 0 : index
    %c0_13 = arith.constant 0 : index
    %16 = vector.load %arg8[%c0_12, %c0_13] : memref<128x128xbf16, #tpu.memory_space<vmem>>, vector<128x128xbf16>
    %cst_14 = arith.constant dense<0.000000e+00> : vector<1x128xf32>
    %17 = tpu.matmul %10, %16, %cst_14 {dimension_numbers = #tpu.dot_dimension_numbers<[1], [0], [0], [1], [0, 0, 1, 1], [], []>} : vector<1x128xbf16>, vector<128x128xbf16>, vector<1x128xf32> -> vector<1x128xf32>
    %c0_15 = arith.constant 0 : index
    %c0_16 = arith.constant 0 : index
    %18 = vector.load %arg9[%c0_15, %c0_16] : memref<1x128xf32, #tpu.memory_space<vmem>>, vector<1x128xf32>
    %19 = arith.addf %17, %18 : vector<1x128xf32>
    %c0_17 = arith.constant 0 : index
    %c0_18 = arith.constant 0 : index
    %20 = vector.load %arg10[%c0_17, %c0_18] : memref<128x128xbf16, #tpu.memory_space<vmem>>, vector<128x128xbf16>
    %cst_19 = arith.constant dense<0.000000e+00> : vector<1x128xf32>
    %21 = tpu.matmul %10, %20, %cst_19 {dimension_numbers = #tpu.dot_dimension_numbers<[1], [0], [0], [1], [0, 0, 1, 1], [], []>} : vector<1x128xbf16>, vector<128x128xbf16>, vector<1x128xf32> -> vector<1x128xf32>
    %c0_20 = arith.constant 0 : index
    %c0_21 = arith.constant 0 : index
    %22 = vector.load %arg11[%c0_20, %c0_21] : memref<1x128xf32, #tpu.memory_space<vmem>>, vector<1x128xf32>
    %23 = arith.addf %21, %22 : vector<1x128xf32>
    %c0_22 = arith.constant 0 : index
    %c0_23 = arith.constant 0 : index
    %24 = vector.load %arg8[%c0_22, %c0_23] : memref<128x128xbf16, #tpu.memory_space<vmem>>, vector<128x128xbf16>
    %cst_24 = arith.constant dense<0.000000e+00> : vector<64x128xf32>
    %25 = tpu.matmul %11, %24, %cst_24 {dimension_numbers = #tpu.dot_dimension_numbers<[1], [0], [0], [1], [0, 0, 1, 1], [], []>} : vector<64x128xbf16>, vector<128x128xbf16>, vector<64x128xf32> -> vector<64x128xf32>
    %c0_25 = arith.constant 0 : index
    %c0_26 = arith.constant 0 : index
    %26 = vector.load %arg9[%c0_25, %c0_26] : memref<1x128xf32, #tpu.memory_space<vmem>>, vector<1x128xf32>
    %27 = vector.broadcast %26 : vector<1x128xf32> to vector<64x128xf32>
    %28 = arith.addf %25, %27 : vector<64x128xf32>
    %c0_27 = arith.constant 0 : index
    %c0_28 = arith.constant 0 : index
    %29 = vector.load %arg10[%c0_27, %c0_28] : memref<128x128xbf16, #tpu.memory_space<vmem>>, vector<128x128xbf16>
    %cst_29 = arith.constant dense<0.000000e+00> : vector<64x128xf32>
    %30 = tpu.matmul %11, %29, %cst_29 {dimension_numbers = #tpu.dot_dimension_numbers<[1], [0], [0], [1], [0, 0, 1, 1], [], []>} : vector<64x128xbf16>, vector<128x128xbf16>, vector<64x128xf32> -> vector<64x128xf32>
    %c0_30 = arith.constant 0 : index
    %c0_31 = arith.constant 0 : index
    %31 = vector.load %arg11[%c0_30, %c0_31] : memref<1x128xf32, #tpu.memory_space<vmem>>, vector<1x128xf32>
    %32 = vector.broadcast %31 : vector<1x128xf32> to vector<64x128xf32>
    %33 = arith.addf %30, %32 : vector<64x128xf32>
    %cst_32 = arith.constant 0.176776692 : f32
    %34 = vector.broadcast %cst_32 : f32 to vector<1x128xf32>
    %35 = arith.mulf %15, %34 : vector<1x128xf32>
    %c0_33 = arith.constant 0 : index
    %c0_34 = arith.constant 0 : index
    %36 = vector.load %arg4[%c0_33, %c0_34] : memref<128x4xf32, #tpu.memory_space<vmem>>, vector<128x4xf32>
    %c0_35 = arith.constant 0 : index
    %c0_36 = arith.constant 0 : index
    %37 = vector.load %arg5[%c0_35, %c0_36] : memref<4x128xf32, #tpu.memory_space<vmem>>, vector<4x128xf32>
    %38 = vector.broadcast %35 : vector<1x128xf32> to vector<64x128xf32>
    %39 = arith.mulf %38, %28 : vector<64x128xf32>
    %cst_37 = arith.constant dense<0.000000e+00> : vector<64x4xf32>
    %40 = tpu.matmul %39, %36, %cst_37 {dimension_numbers = #tpu.dot_dimension_numbers<[1], [0], [0], [1], [0, 0, 1, 1], [], []>} : vector<64x128xf32>, vector<128x4xf32>, vector<64x4xf32> -> vector<64x4xf32>
    %41 = arith.mulf %35, %19 : vector<1x128xf32>
    %cst_38 = arith.constant dense<0.000000e+00> : vector<1x4xf32>
    %42 = tpu.matmul %41, %36, %cst_38 {dimension_numbers = #tpu.dot_dimension_numbers<[1], [0], [0], [1], [0, 0, 1, 1], [], []>} : vector<1x128xf32>, vector<128x4xf32>, vector<1x4xf32> -> vector<1x4xf32>
    %cst_39 = arith.constant dense<0xFF800000> : vector<4xf32>
    %43 = vector.multi_reduction <maximumf>, %40, %cst_39 [0] : vector<64x4xf32> to vector<4xf32>
    %44 = vector.shape_cast %43 : vector<4xf32> to vector<1x4xf32>
    %45 = arith.maximumf %44, %42 : vector<1x4xf32>
    %46 = vector.broadcast %45 : vector<1x4xf32> to vector<64x4xf32>
    %47 = arith.subf %40, %46 : vector<64x4xf32>
    %48 = math.exp %47 : vector<64x4xf32>
    %49 = arith.subf %42, %45 : vector<1x4xf32>
    %50 = math.exp %49 : vector<1x4xf32>
    %cst_40 = arith.constant dense<0.000000e+00> : vector<4xf32>
    %51 = vector.multi_reduction <add>, %48, %cst_40 [0] : vector<64x4xf32> to vector<4xf32>
    %52 = vector.shape_cast %51 : vector<4xf32> to vector<1x4xf32>
    %53 = arith.addf %52, %50 : vector<1x4xf32>
    %54 = tpu.reciprocal %53 {approx = true} : vector<1x4xf32> -> vector<1x4xf32>
    %cst_41 = arith.constant dense<0.000000e+00> : vector<64x128xf32>
    %55 = tpu.matmul %48, %37, %cst_41 {dimension_numbers = #tpu.dot_dimension_numbers<[1], [0], [0], [1], [0, 0, 1, 1], [], []>} : vector<64x4xf32>, vector<4x128xf32>, vector<64x128xf32> -> vector<64x128xf32>
    %cst_42 = arith.constant dense<0.000000e+00> : vector<1x128xf32>
    %56 = tpu.matmul %50, %37, %cst_42 {dimension_numbers = #tpu.dot_dimension_numbers<[1], [0], [0], [1], [0, 0, 1, 1], [], []>} : vector<1x4xf32>, vector<4x128xf32>, vector<1x128xf32> -> vector<1x128xf32>
    %cst_43 = arith.constant dense<0.000000e+00> : vector<1x128xf32>
    %57 = tpu.matmul %54, %37, %cst_43 {dimension_numbers = #tpu.dot_dimension_numbers<[1], [0], [0], [1], [0, 0, 1, 1], [], []>} : vector<1x4xf32>, vector<4x128xf32>, vector<1x128xf32> -> vector<1x128xf32>
    %58 = arith.mulf %55, %33 : vector<64x128xf32>
    %cst_44 = arith.constant dense<0.000000e+00> : vector<128xf32>
    %59 = vector.multi_reduction <add>, %58, %cst_44 [0] : vector<64x128xf32> to vector<128xf32>
    %60 = vector.shape_cast %59 : vector<128xf32> to vector<1x128xf32>
    %61 = arith.mulf %56, %23 : vector<1x128xf32>
    %62 = arith.addf %60, %61 : vector<1x128xf32>
    %63 = arith.mulf %62, %57 : vector<1x128xf32>
    %64 = arith.truncf %63 : vector<1x128xf32> to vector<1x128xbf16>
    %c0_45 = arith.constant 0 : index
    %c0_46 = arith.constant 0 : index
    %65 = vector.load %arg12[%c0_45, %c0_46] : memref<128x128xbf16, #tpu.memory_space<vmem>>, vector<128x128xbf16>
    %cst_47 = arith.constant dense<0.000000e+00> : vector<1x128xf32>
    %66 = tpu.matmul %64, %65, %cst_47 {dimension_numbers = #tpu.dot_dimension_numbers<[1], [0], [0], [1], [0, 0, 1, 1], [], []>} : vector<1x128xbf16>, vector<128x128xbf16>, vector<1x128xf32> -> vector<1x128xf32>
    %c0_48 = arith.constant 0 : index
    %c0_49 = arith.constant 0 : index
    %67 = vector.load %arg13[%c0_48, %c0_49] : memref<1x128xf32, #tpu.memory_space<vmem>>, vector<1x128xf32>
    %68 = arith.addf %66, %67 : vector<1x128xf32>
    %69 = vector.shape_cast %68 : vector<1x128xf32> to vector<1x1x128xf32>
    %c0_50 = arith.constant 0 : index
    %c0_51 = arith.constant 0 : index
    %c0_52 = arith.constant 0 : index
    %70 = vector.load %arg14[%c0_50, %c0_51, %c0_52] : memref<1x1x128xf32, #tpu.memory_space<vmem>>, vector<1x1x128xf32>
    tpu.vector_store %arg14[%c0_50, %c0_51, %c0_52], %69 {strides = array<i32>} : memref<1x1x128xf32, #tpu.memory_space<vmem>>, vector<1x1x128xf32>,
    return
  }
  func.func @transform_0(%arg0: i32) -> (i32, i32, i32) {
    %c0_i32 = arith.constant 0 : i32
    %c0_i32_0 = arith.constant 0 : i32
    %c0_i32_1 = arith.constant 0 : i32
    return %arg0, %c0_i32, %c0_i32_0 : i32, i32, i32
  }
  func.func @transform_1(%arg0: i32) -> (i32, i32) {
    %c0_i32 = arith.constant 0 : i32
    %c0_i32_0 = arith.constant 0 : i32
    %c0_i32_1 = arith.constant 0 : i32
    return %c0_i32, %c0_i32_0 : i32, i32
  }
  func.func @transform_2(%arg0: i32) -> (i32, i32) {
    %c0_i32 = arith.constant 0 : i32
    %c0_i32_0 = arith.constant 0 : i32
    %c0_i32_1 = arith.constant 0 : i32
    return %c0_i32, %c0_i32_0 : i32, i32
  }
  func.func @transform_3(%arg0: i32) -> (i32, i32) {
    %c0_i32 = arith.constant 0 : i32
    %c0_i32_0 = arith.constant 0 : i32
    %c0_i32_1 = arith.constant 0 : i32
    return %c0_i32, %c0_i32_0 : i32, i32
  }
  func.func @transform_4(%arg0: i32) -> (i32, i32) {
    %c0_i32 = arith.constant 0 : i32
    %c0_i32_0 = arith.constant 0 : i32
    %c0_i32_1 = arith.constant 0 : i32
    return %c0_i32, %c0_i32_0 : i32, i32
  }
  func.func @transform_5(%arg0: i32) -> (i32, i32) {
    %c0_i32 = arith.constant 0 : i32
    %c0_i32_0 = arith.constant 0 : i32
    %c0_i32_1 = arith.constant 0 : i32
    return %c0_i32, %c0_i32_0 : i32, i32
  }
  func.func @transform_6(%arg0: i32) -> (i32, i32) {
    %c0_i32 = arith.constant 0 : i32
    %c0_i32_0 = arith.constant 0 : i32
    %c0_i32_1 = arith.constant 0 : i32
    return %c0_i32, %c0_i32_0 : i32, i32
  }
  func.func @transform_7(%arg0: i32) -> (i32, i32) {
    %c0_i32 = arith.constant 0 : i32
    %c0_i32_0 = arith.constant 0 : i32
    %c0_i32_1 = arith.constant 0 : i32
    return %c0_i32, %c0_i32_0 : i32, i32
  }
  func.func @transform_8(%arg0: i32) -> (i32, i32) {
    %c0_i32 = arith.constant 0 : i32
    %c0_i32_0 = arith.constant 0 : i32
    %c0_i32_1 = arith.constant 0 : i32
    return %c0_i32, %c0_i32_0 : i32, i32
  }
  func.func @transform_9(%arg0: i32) -> (i32, i32) {
    %c0_i32 = arith.constant 0 : i32
    %c0_i32_0 = arith.constant 0 : i32
    %c0_i32_1 = arith.constant 0 : i32
    return %c0_i32, %c0_i32_0 : i32, i32
  }
  func.func @transform_10(%arg0: i32) -> (i32, i32) {
    %c0_i32 = arith.constant 0 : i32
    %c0_i32_0 = arith.constant 0 : i32
    %c0_i32_1 = arith.constant 0 : i32
    return %c0_i32, %c0_i32_0 : i32, i32
  }
  func.func @transform_11(%arg0: i32) -> (i32, i32) {
    %c0_i32 = arith.constant 0 : i32
    %c0_i32_0 = arith.constant 0 : i32
    %c0_i32_1 = arith.constant 0 : i32
    return %c0_i32, %c0_i32_0 : i32, i32
  }
  func.func @transform_12(%arg0: i32) -> (i32, i32) {
    %c0_i32 = arith.constant 0 : i32
    %c0_i32_0 = arith.constant 0 : i32
    %c0_i32_1 = arith.constant 0 : i32
    return %c0_i32, %c0_i32_0 : i32, i32
  }
  func.func @transform_13(%arg0: i32) -> (i32, i32, i32) {
    %c0_i32 = arith.constant 0 : i32
    %c0_i32_0 = arith.constant 0 : i32
    %c0_i32_1 = arith.constant 0 : i32
    return %arg0, %c0_i32, %c0_i32_0 : i32, i32, i32
  }
}

</mosaic_0001>

<bundles_post_ra>
// kernel: tpu_custom_call.1
= control target key start
LH: loop header
LB: loop body
LE: loop exit
PB: predicated region body
PF: predicated region fallthrough
CT: control target
= control target key end

     0   :  { %s3178_s0 = inlined_call_operand.vmem [shape: f32[2,64,128], index: 0, kind: input, shape index: {}]   ;;  %s3179_s1 = inlined_call_operand.vmem [shape: f32[1,128], index: 1, kind: input, shape index: {}]   ;;  %s3180_s2 = inlined_call_operand.hbm [shape: f32[64,128], index: 2, kind: input, shape index: {}]   ;;  %s3181_s3 = inlined_call_operand.vmem [shape: f32[128,4], index: 3, kind: input, shape index: {}]   ;;  %s3182_s4 = inlined_call_operand.vmem [shape: f32[4,128], index: 4, kind: input, shape index: {}]   ;;  %s3183_s5 = inlined_call_operand.hbm [shape: bf16[128,128], index: 5, kind: input, shape index: {}]   ;;  %s3184_s6 = inlined_call_operand.vmem [shape: f32[1,128], index: 6, kind: input, shape index: {}]   ;;  %s3185_s7 = inlined_call_operand.hbm [shape: bf16[128,128], index: 7, kind: input, shape index: {}]   ;;  %s3186_s8 = inlined_call_operand.vmem [shape: f32[1,128], index: 8, kind: input, shape index: {}]   ;;  %s3187_s9 = inlined_call_operand.hbm [shape: bf16[128,128], index: 9, kind: input, shape index: {}]   ;;  %s3188_s10 = inlined_call_operand.vmem [shape: f32[1,128], index: 10, kind: input, shape index: {}]   ;;  %s3189_s11 = inlined_call_operand.hbm [shape: bf16[128,128], index: 11, kind: input, shape index: {}]   ;;  %s3190_s12 = inlined_call_operand.vmem [shape: f32[1,128], index: 12, kind: input, shape index: {}]   ;;  %s3191_s13 = inlined_call_operand.hbm [shape: f32[2,1,128], index: 13, kind: output, shape index: {}]  }
   0x1   :  { %3202 = sst [smem:[#allocation21_spill]] %s3183_s5 }
   0x2   :  { %18 = vsyncpa [#allocation3], 0 }
   0x3   :  { %19 = vsyncpa [#allocation6], 0 }
   0x4   :  { %20 = vsyncpa [#allocation9], 0 }
   0x5   :  { %21 = vsyncpa [#allocation4], 0 }
   0x6   :  { %23 = vsyncpa [#allocation4 + $0x1], 0  ;;  %s2670_s25 = smov 0   ;;  %s2672_s26 = smov 0  }
   0x7   :  { %s2674_s27 = smov 0   ;;  %s2676_s28 = smov 0  }
   0x8 LB: > { %3203 = sst [smem:[#allocation16_spill]] %s2574_s25  ;;  %s2691_s29 = sadd.s32 4294967295, %s2586_s28   ;;  %s2586_s28 = sphi %s2676_s28, %s3224_s28   ;;  %s2582_s27 = sphi %s2674_s27, %s3226_s27   ;;  %s2578_s26 = sphi %s2672_s26, %s3228_s26   ;;  %s2574_s25 = sphi %s2670_s25, %s3227_s25  }
   0x9   : > { %3204 = sst [smem:[#allocation17_spill]] %s2582_s27  ;;  %s1826_s30 = sadd.s32 4294967294, %s2586_s28  }
   0xa   : > { %s2695_s14 = sadd.s32 1, %s2586_s28   ;;  %s314_s15 = sadd.s32 1, %s2582_s27 }
   0xb   : > { %3205 = sst [smem:[#allocation18_spill]] %s2695_s14  ;;  %s311_s16 = ssub.s32 %s2586_s28, %s2695_s14 }
   0xc   : > { %p324_p0 = scmp.ne.s32.totalorder %s2582_s27, %s2578_s26  ;;  %p312_p1 = scmp.eq.s32.totalorder %s311_s16, 0 }
   0xd   : > { %p325_p2 = scmp.eq.s32.totalorder %s2691_s29, 1  ;;  %p330_p3 = scmp.ne.s32.totalorder %s2578_s26, %s2574_s25 }
   0xe   : > { %p331_p4 = scmp.eq.s32.totalorder %s1826_s30, 1  ;;  %p1827_p7 = scmp.ge.s32.totalorder %s2586_s28, 1 }
   0xf   : > { %s2706_s17 = scalar_select %p312_p1, %s2582_s27, %s314_s15  }
  0x10   : > { %p2708_p5 = por %p325_p2, %p324_p0  ;;  %p2712_p6 = por %p331_p4, %p330_p3 }
  0x11   : > { %3206 = sst [smem:[#allocation19_spill]] %s2706_s17  ;;  %p338_p8 = scmp.lt.s32.totalorder %s2586_s28, 3 }
  0x12   : > { %s3208_s19 = scalar_select %p2712_p6, 1, 0 }
  0x13   : > { %p3197_p9 = scmp.eq.s32.totalorder %s2691_s29, 0  ;;  %p2719_p10 = pnand %p1827_p7, %p338_p8 }
  0x14   : > { %3209 = sst [smem:[#allocation20_spill]] %s3208_s19  ;;  %s2588_s21 = smov [#allocation5]  }
  0x15   : > { %s372_s22 = sshll.u32 %s2588_s21, 4  ;;  %p2258_p11 = pneg %p2719_p10  ;;  %s373_s22 = int_to_ptr.vmem [resolvable:$true] %s372_s22 }
  0x16   : > { %s2589_s24 = smov [#allocation8]   ;;  %s2590_s15 = smov [#allocation2]  }
  0x17   : > { %p2727_p12 = pnand %p3197_p9, %p2258_p11  ;;  %s404_s30 = sshll.u32 %s2589_s24, 4  ;;  %s405_s30 = int_to_ptr.vmem [resolvable:$true] %s404_s30 }
  0x18   : > { %s353_s16 = sshll.u32 %s2590_s15, 4  ;;  %s2395_s21 = scalar_lea.vmem %s373_s22, 1024  ;;  %s354_s16 = int_to_ptr.vmem [resolvable:$true] %s353_s16 }
  0x19   : > { %p2733_p13 = pneg %p2727_p12  ;;  %p2396_p0 = scmp.ne.s32.totalorder %s373_s22, %s2395_s21 }
  0x1a   : > { %p2403_p3 = scmp.lt.s32.totalorder %s373_s22, %s373_s22  ;;  %p2404_p4 = scmp.lt.s32.totalorder %s2395_s21, %s2395_s21 }
  0x1b   : > { %p2398_p1 = pnand %p2396_p0, %p2733_p13 }
  0x1c   : > { %p2405_p7 = por %p2404_p4, %p2403_p3 }
  0x1d   : > { %p2399_p2 = pneg %p2398_p1 }
  0x1f   : > { %p2406_p8 = pnand %p2405_p7, %p2399_p2 }
  0x21   : > { %2409 = shalt.err (!%p2406_p8)
}
  0x22   : > { %s3198_s24 = smov 64   ;;  %s3200_s15 = smov 4  }
  0x23   : > { %s3213_s5 = sld [smem:[#allocation21_spill]]  ;;  %s2421_s19 = scalar_lea.vmem %s405_s30, 1024 }
  0x24   : > { %p2422_p11 = scmp.ne.s32.totalorder %s405_s30, %s2421_s19  ;;  %p2429_p3 = scmp.lt.s32.totalorder %s405_s30, %s405_s30 }
  0x25   : > { %p2430_p2 = scmp.lt.s32.totalorder %s2421_s19, %s2421_s19 }
  0x26   : > { %p2424_p0 = pnand %p2422_p11, %p2733_p13 }
  0x27   : > { %p2431_p4 = por %p2430_p2, %p2429_p3 }
  0x28   : > { %p2425_p1 = pneg %p2424_p0 }
  0x29   : > { %2264 = dma.hbm_to_vmem [thread:$0]  (!%p2727_p12), %s3213_s5, 1024, %s373_s22, [#allocation6], %s3198_s24, %s3198_s24, %s3200_s15  }
  0x2a   : > { %p2432_p7 = pnand %p2431_p4, %p2425_p1 }
  0x2c   : > { %2435 = shalt.err (!%p2432_p7)
}
  0x2d   : > { %2270 = dma.hbm_to_vmem [thread:$0]  (!%p2727_p12), %s3187_s9, 1024, %s405_s30, [#allocation9], %s3198_s24, %s3198_s24, %s3200_s15  }
  0x2e   : > { %s2447_s27 = scalar_lea.vmem %s354_s16, 1024  ;;  %p2455_p9 = scmp.lt.s32.totalorder %s354_s16, %s354_s16 }
  0x2f   : > { %p2448_p8 = scmp.ne.s32.totalorder %s354_s16, %s2447_s27  ;;  %p2456_p3 = scmp.lt.s32.totalorder %s2447_s27, %s2447_s27 }
  0x31   : > { %p2450_p11 = pnand %p2448_p8, %p2733_p13  ;;  %p2457_p1 = por %p2456_p3, %p2455_p9 }
  0x33   : > { %p2451_p0 = pneg %p2450_p11 }
  0x35   : > { %p2458_p2 = pnand %p2457_p1, %p2451_p0 }
  0x37   : > { %2461 = shalt.err (!%p2458_p2)
}
  0x38   : > { %s2593_s14 = smov 128   ;;  %s2594_s19 = smov 8  }
  0x39   : > { %2261 = dma.hbm_to_vmem [thread:$0]  (!%p2727_p12), %s3180_s2, 1024, %s354_s16, [#allocation3], %s2593_s14, %s2593_s14, %s2594_s19  }
  0x3a   : > { %s2595_s30 = smov [#allocation7]   ;;  %s2596_s24 = smov [#allocation10]  }
  0x3b   : > { %s388_s21 = sshll.u32 %s2595_s30, 4  ;;  %s420_s15 = sshll.u32 %s2596_s24, 4  ;;  %s389_s21 = int_to_ptr.vmem [resolvable:$true] %s388_s21  ;;  %s421_s15 = int_to_ptr.vmem [resolvable:$true] %s420_s15 }
  0x3c   : > { %s2473_s5 = scalar_lea.vmem %s389_s21, 1024  ;;  %p2481_p8 = scmp.lt.s32.totalorder %s389_s21, %s389_s21 }
  0x3d   : > { %p2474_p4 = scmp.ne.s32.totalorder %s389_s21, %s2473_s5  ;;  %p2482_p11 = scmp.lt.s32.totalorder %s2473_s5, %s2473_s5 }
  0x3f   : > { %p2476_p9 = pnand %p2474_p4, %p2733_p13  ;;  %p2483_p0 = por %p2482_p11, %p2481_p8 }
  0x41   : > { %p2477_p7 = pneg %p2476_p9 }
  0x43   : > { %p2484_p3 = pnand %p2483_p0, %p2477_p7 }
  0x45   : > { %2487 = shalt.err (!%p2484_p3)
}
  0x46   : > { %s3214_s27 = smov 4   ;;  %s3215_s22 = smov 64  }
  0x47   : > { %2267 = dma.hbm_to_vmem [thread:$0]  (!%p2727_p12), %s3185_s7, 1024, %s389_s21, [#allocation6], %s3215_s22, %s3215_s22, %s3214_s27  }
  0x48   : > { %s2499_s24 = scalar_lea.vmem %s421_s15, 1024  ;;  %p2507_p9 = scmp.lt.s32.totalorder %s421_s15, %s421_s15 }
  0x49   : > { %p2500_p1 = scmp.ne.s32.totalorder %s421_s15, %s2499_s24  ;;  %p2508_p8 = scmp.lt.s32.totalorder %s2499_s24, %s2499_s24 }
  0x4b   : > { %p2502_p2 = pnand %p2500_p1, %p2733_p13  ;;  %p2509_p7 = por %p2508_p8, %p2507_p9 }
  0x4d   : > { %p2503_p4 = pneg %p2502_p2 }
  0x4f   : > { %p2510_p11 = pnand %p2509_p7, %p2503_p4 }
  0x51   : > { %2513 = shalt.err (!%p2510_p11)
}
  0x52   : > { %2273 = dma.hbm_to_vmem [thread:$0]  (!%p2727_p12), %s3189_s11, 1024, %s421_s15, [#allocation9], %s3215_s22, %s3215_s22, %s3214_s27  }
  0x53   : > { %447 = sbr.rel (%p2719_p10) target bundleno = 1069 (0x42d), region = 72  ;;  %p3216_p13 = scmp.eq.s32.totalorder (!%p2719_p10), %s2691_s29, 0 }
  0x58   : > { %2557 = dma.done.wait (%p3216_p13), [#allocation3], 1024   ;;  %p3217_p0 = pmov %p3216_p13 }
  0x5a   : > { %2559 = vsyncadd (%p3217_p0), [#allocation3], 4294966272  ;;  %p3218_p3 = pmov %p3217_p0 }
  0x5b   : > { %p3219_p1 = pmov %p3217_p0 }
  0x5c   : > { %2561 = dma.done.wait (%p3218_p3), [#allocation6], 2048  }
  0x5d   : > { %2563 = vsyncadd (%p3219_p1), [#allocation6], 4294965248  ;;  %p3220_p2 = pmov %p3217_p0 }
  0x5e   : > { %p3221_p12 = pmov %p3217_p0 }
  0x5f   : > { %2565 = dma.done.wait (%p3220_p2), [#allocation9], 2048  }
  0x60   : > { %2567 = vsyncadd (%p3221_p12), [#allocation9], 4294965248  ;;  %v2597_v0 = vmov 0.0   ;;  %vm2598_vm0 = vmmov 0   ;;  %v2332_v1 = vld [vmem:[#allocation5 + $0x38] sm:$0xff]   ;;  %v2334_v3 = vld [vmem:[#allocation5 + $0x30] sm:$0xff]  }
  0x61   : > { %2005 = vmatprep.subr.bf16.mxu0 %v2597_v0  ;;  %2025 = vmatprep.subr.bf16.mxu1 %v2597_v0  ;;  %v2804_v2 = vld [vmem:[#allocation7 + $0x38] sm:$0xff]   ;;  %p506_p10 = scmp.lt.s32.totalorder %s2691_s29, 1  ;;  %v2809_v4 = vld [vmem:[#allocation7 + $0x30] sm:$0xff]   ;;  %v2336_v5 = vld [vmem:[#allocation5 + $0x28] sm:$0xff]   ;;  %vm1322_vm1 = vcmask 1043456   ;;  %vm1221_vm2 = vcmask 31744  }
  0x62   : > { %2021 = vmatprep.mubr.msk.bf16.mxu0 %vm2598_vm0, %v2597_v0  ;;  %2041 = vmatprep.mubr.msk.bf16.mxu1 %vm2598_vm0, %v2597_v0  ;;  %v2815_v6 = vld [vmem:[#allocation7 + $0x28] sm:$0xff]   ;;  %v2338_v7 = vld [vmem:[#allocation5 + $0x20] sm:$0xff]   ;;  %v2340_v9 = vld [vmem:[#allocation5 + $0x18] sm:$0xff]   ;;  %s504_s30 = sand.u32 1, %s2578_s26   ;;  %s1887_s22 = sshll.u32 %s2691_s29, 4 }
  0x63   : > { %2006 = vmatpush3.bf16.msra.mxu0 %v2332_v1  ;;  %2026 = vmatpush3.bf16.msra.mxu1 %v2804_v2  ;;  %s507_s17 = scalar_select %p506_p10, %s2691_s29, 1  ;;  %v2820_v8 = vld [vmem:[#allocation7 + $0x20] sm:$0xff]   ;;  %v2830_v10 = vld [vmem:[#allocation7 + $0x18] sm:$0xff]   ;;  %v2342_v15 = vld [vmem:[#allocation5 + $0x10] sm:$0xff]  }
  0x64   : > { %2007 = vmatprep.subr.bf16.mxu0 %v2597_v0  ;;  %2027 = vmatprep.subr.bf16.mxu1 %v2597_v0  ;;  %v2843_v17 = vld [vmem:[#allocation7 + $0x10] sm:$0xff]   ;;  %v2344_v20 = vld [vmem:[#allocation5 + $0x8] sm:$0xff]   ;;  %v2346_v26 = vld [vmem:[#allocation5] sm:$0xff]   ;;  %s505_s16 = scalar_lea.vmem [#allocation11], %s504_s30  ;;  %s3137_s19 = scalar_lea.hbm %s3191_s13, %s1887_s22 }
  0x65   : > { %s1890_s20 = sshll.u32 %s507_s17, 6  ;;  %v2856_v23 = vld [vmem:[#allocation7 + $0x8] sm:$0xff]   ;;  %v2869_v29 = vld [vmem:[#allocation7] sm:$0xff]   ;;  %v2348_v47 = vld [vmem:[#allocation8 + $0x38] sm:$0xff]   ;;  %s1721_s14 = sshll.u32 %s505_s16, 4  ;;  %s3139_s14 = int_to_ptr.vmem [resolvable:$true] %s1721_s14 }
  0x66   : > { %s2826_s25 = scalar_lea.vmem %s3178_s0, %s1890_s20  ;;  %v537_v36 = vld [vmem:[#allocation2] sm:$0xff]  ;;  %v538_v38 = vld [vmem:[#allocation2 + $0x8] sm:$0xff]  ;;  %v2885_v48 = vld [vmem:[#allocation8 + $0x30] sm:$0xff]   ;;  %s1709_s17 = scalar_lea.sflag [#allocation4], %s504_s30 }
  0x67   : > { %2008 = vmatpush3.bf16.msra.mxu0 %v2334_v3  ;;  %2028 = vmatpush3.bf16.msra.mxu1 %v2809_v4  ;;  %v512_v11 = vld [vmem:[%s2826_s25] sm:$0xff]  ;;  %v513_v12 = vld [vmem:[%s2826_s25 + $0x8] sm:$0xff]  ;;  %v2836_v13 = vld [vmem:[%s2826_s25 + $0x10] sm:$0xff]  ;;  %s2514_s20 = scalar_lea.vmem %s3139_s14, 16  ;;  %s2599_s29 = smov [#allocation11]  }
  0x68   : > { %2009 = vmatprep.subr.bf16.mxu0 %v2597_v0  ;;  %2029 = vmatprep.subr.bf16.mxu1 %v2597_v0  ;;  %v520_v14 = vadd.f32 %v513_v12, %v512_v11  ;;  %v2839_v16 = vld [vmem:[%s2826_s25 + $0x18] sm:$0xff]  ;;  %v2848_v19 = vld [vmem:[%s2826_s25 + $0x20] sm:$0xff]  ;;  %v2852_v22 = vld [vmem:[%s2826_s25 + $0x28] sm:$0xff]  ;;  %v545_v41 = vadd.f32 %v537_v36, %v512_v11  ;;  %v546_v42 = vadd.f32 %v538_v38, %v513_v12  ;;  %p2515_p4 = scmp.ne.s32.totalorder %s3139_s14, %s2514_s20  ;;  %s2518_s23 = sshll.u32 %s2599_s29, 4  ;;  %s2519_s23 = int_to_ptr.vmem [resolvable:$false] %s2518_s23 }
  0x69   : > { %v2861_v25 = vld [vmem:[%s2826_s25 + $0x30] sm:$0xff]  ;;  %v2865_v28 = vld [vmem:[%s2826_s25 + $0x38] sm:$0xff]  ;;  %v535_v40 = vld [vmem:[%s3179_s1] sm:$0x1]  ;;  %s2520_s15 = scalar_lea.vmem %s2519_s23, 32  ;;  %p2521_p7 = scmp.lt.s32.totalorder %s3139_s14, %s2519_s23 }
  0x6a   : > { %v521_v18 = vadd.f32 %v520_v14, %v2836_v13  ;;  %v2880_v45 = vpack.c.bf16 %v546_v42, %v545_v41  ;;  %v2893_v49 = vld [vmem:[#allocation8 + $0x28] sm:$0xff]   ;;  %v2899_v50 = vld [vmem:[#allocation8 + $0x20] sm:$0xff]   ;;  %v2905_v51 = vld [vmem:[#allocation8 + $0x18] sm:$0xff]   ;;  %p2516_p9 = pnand %p2515_p4, %p2708_p5  ;;  %p2522_p11 = scmp.lt.s32.totalorder %s2520_s15, %s2514_s20 }
  0x6b   : > { %2010 = vmatpush3.bf16.msra.mxu0 %v2336_v5  ;;  %2030 = vmatpush3.bf16.msra.mxu1 %v2815_v6  ;;  %v2911_v52 = vld [vmem:[#allocation8 + $0x10] sm:$0xff]   ;;  %v540_v54 = vld [vmem:[#allocation2 + $0x18] sm:$0xff]  ;;  %v541_v55 = vld [vmem:[#allocation2 + $0x20] sm:$0xff] }
  0x6c   : > { %2011 = vmatprep.subr.bf16.mxu0 %v2597_v0  ;;  %2031 = vmatprep.subr.bf16.mxu1 %v2597_v0  ;;  %v522_v21 = vadd.f32 %v521_v18, %v2839_v16  ;;  %v539_v53 = vld [vmem:[#allocation2 + $0x10] sm:$0xff]  ;;  %v542_v56 = vld [vmem:[#allocation2 + $0x28] sm:$0xff]  ;;  %v548_v59 = vadd.f32 %v540_v54, %v2839_v16  ;;  %v549_v60 = vadd.f32 %v541_v55, %v2848_v19  ;;  %v2927_v62 = vld [vmem:[#allocation8] sm:$0xff]   ;;  %p2517_p8 = pneg %p2516_p9  ;;  %p2523_p13 = por %p2522_p11, %p2521_p7 }
  0x6d   : > { %v2917_v57 = vld [vmem:[#allocation8 + $0x8] sm:$0xff]   ;;  %v547_v58 = vadd.f32 %v539_v53, %v2836_v13  ;;  %v550_v61 = vadd.f32 %v542_v56, %v2852_v22  ;;  %v544_v3 = vld [vmem:[#allocation2 + $0x38] sm:$0xff]  ;;  %v1026_v12 = vld [vmem:[%s3181_s3 + $0x50] sm:$0xff] }
  0x6e   : > { %v523_v24 = vadd.f32 %v522_v21, %v2848_v19  ;;  %v1027_v11 = vld [vmem:[%s3181_s3 + $0x58] sm:$0xff]  ;;  %v1025_v13 = vld [vmem:[%s3181_s3 + $0x48] sm:$0xff]  ;;  %v1024_v14 = vld [vmem:[%s3181_s3 + $0x40] sm:$0xff]  ;;  %p2524_p0 = pnand %p2523_p13, %p2517_p8 }
  0x6f   : > { %2012 = vmatpush3.bf16.msra.mxu0 %v2338_v7  ;;  %2032 = vmatpush3.bf16.msra.mxu1 %v2820_v8  ;;  %v2930_v63 = vpack.c.bf16 %v548_v59, %v547_v58  ;;  %v2933_v1 = vpack.c.bf16 %v550_v61, %v549_v60  ;;  %v1030_v7 = vld [vmem:[%s3181_s3 + $0x70] sm:$0xff]  ;;  %v1020_v18 = vld [vmem:[%s3181_s3 + $0x20] sm:$0xff]  ;;  %v1019_v19 = vld [vmem:[%s3181_s3 + $0x18] sm:$0xff] }
  0x70   : > { %2013 = vmatprep.subr.bf16.mxu0 %v2597_v0  ;;  %2033 = vmatprep.subr.bf16.mxu1 %v2597_v0  ;;  %v524_v27 = vadd.f32 %v523_v24, %v2852_v22  ;;  %v1022_v16 = vld [vmem:[%s3181_s3 + $0x30] sm:$0xff]  ;;  %v1017_v21 = vld [vmem:[%s3181_s3 + $0x8] sm:$0xff]  ;;  %v1016_v22 = vld [vmem:[%s3181_s3] sm:$0xff] }
  0x71   : > { %v679_v24 = vld [vmem:[%s3186_s8] sm:$0x1] }
  0x72   : > { %v525_v30 = vadd.f32 %v524_v27, %v2861_v25 }
  0x73   : > { %2014 = vmatpush3.bf16.msra.mxu0 %v2340_v9  ;;  %2034 = vmatpush3.bf16.msra.mxu1 %v2830_v10  ;;  %v1029_v9 = vld [vmem:[%s3181_s3 + $0x68] sm:$0xff] }
  0x74   : > { %2015 = vmatprep.subr.bf16.mxu0 %v2597_v0  ;;  %2035 = vmatprep.subr.bf16.mxu1 %v2597_v0  ;;  %v526_v31 = vadd.f32 %v525_v30, %v2865_v28 }
  0x76   : > { %v527_v32 = vrot.slane %v526_v31, 4 }
  0x77   : > { %2016 = vmatpush3.bf16.msra.mxu0 %v2342_v15  ;;  %2036 = vmatpush3.bf16.msra.mxu1 %v2843_v17  ;;  %v1023_v15 = vld [vmem:[%s3181_s3 + $0x38] sm:$0xff] }
  0x78   : > { %2017 = vmatprep.subr.bf16.mxu0 %v2597_v0  ;;  %2037 = vmatprep.subr.bf16.mxu1 %v2597_v0  ;;  %v528_v33 = vadd.f32 %v527_v32, %v526_v31 }
  0x7a   : > { %v529_v34 = vrot.slane %v528_v33, 2 }
  0x7b   : > { %2018 = vmatpush3.bf16.msra.mxu0 %v2344_v20  ;;  %2038 = vmatpush3.bf16.msra.mxu1 %v2856_v23  ;;  %v1018_v20 = vld [vmem:[%s3181_s3 + $0x10] sm:$0xff] }
  0x7c   : > { %2019 = vmatprep.subr.bf16.mxu0 %v2597_v0  ;;  %2039 = vmatprep.subr.bf16.mxu1 %v2597_v0  ;;  %v530_v35 = vadd.f32 %v529_v34, %v528_v33 }
  0x7e   : > { %v531_v37 = vrot.slane %v530_v35, 1 }
  0x7f   : > { %2020 = vmatpush3.bf16.msra.mxu0 %v2346_v26  ;;  %2040 = vmatpush3.bf16.msra.mxu1 %v2869_v29 }
  0x80   : > { %2045 = vmatprep.subr.bf16.mxu0 %v2597_v0  ;;  %2065 = vmatprep.subr.bf16.mxu1 %v2804_v2  ;;  %v532_v39 = vadd.f32 %v531_v37, %v530_v35  ;;  %v874_v37 = vlaneseq }
  0x82   : > { %v534_v43 = vmul.f32 0.015625, %v532_v39  ;;  %v875_v38 = vshrl.u32 %v874_v37, 7 }
  0x84   : > { %v536_v44 = vadd.f32 %v535_v40, %v534_v43  ;;  %v3039_v39 = vsub.s32 0, %v875_v38 }
  0x86   : > { %v553_v46 = vpack.c.bf16 %v536_v44, %v536_v44  ;;  %v877_v41 = vrot.slane %v679_v24, %v3039_v39 }
  0x88   : > { %2022 = vmatmul.mubr.bf16.vlgmr.msra.gmra.mxu0 %v553_v46  ;;  %2042 = vmatmul.mubr.bf16.vlgmr.msra.gmra.mxu1 %v553_v46 }
  0x89   : > { %2066 = vmatpush3.bf16.msra.mxu1 %v2804_v2  ;;  %2081 = vmatprep.mubr.bf16.mxu1 %v2880_v45  ;;  %v543_v2 = vld [vmem:[#allocation2 + $0x30] sm:$0xff] }
  0x8a   : > { %2067 = vmatprep.subr.bf16.mxu1 %v2809_v4  ;;  %2046 = vmatpush3.bf16.msra.mxu0 %v2348_v47  ;;  %v551_v5 = vadd.f32 %v543_v2, %v2861_v25 }
  0x8b   : > { %2047 = vmatprep.subr.bf16.mxu0 %v2597_v0  ;;  %2061 = vmatprep.mubr.msk.bf16.mxu0 %vm2598_vm0, %v2597_v0 }
  0x8d   : > { %2068 = vmatpush3.bf16.msra.mxu1 %v2809_v4  ;;  %v2938_v4 = vld [vmem:[%s3181_s3 + $0x78] sm:$0xff] }
  0x8e   : > { %2069 = vmatprep.subr.bf16.mxu1 %v2815_v6  ;;  %2048 = vmatpush3.bf16.msra.mxu0 %v2885_v48 }
  0x8f   : > { %2049 = vmatprep.subr.bf16.mxu0 %v2597_v0 }
  0x91   : > { %2070 = vmatpush3.bf16.msra.mxu1 %v2815_v6  ;;  %v552_v6 = vadd.f32 %v544_v3, %v2865_v28 }
  0x92   : > { %2071 = vmatprep.subr.bf16.mxu1 %v2820_v8  ;;  %2050 = vmatpush3.bf16.msra.mxu0 %v2893_v49 }
  0x93   : > { %2051 = vmatprep.subr.bf16.mxu0 %v2597_v0 }
  0x95   : > { %2072 = vmatpush3.bf16.msra.mxu1 %v2820_v8  ;;  %v2952_v8 = vpack.c.bf16 %v552_v6, %v551_v5 }
  0x96   : > { %2073 = vmatprep.subr.bf16.mxu1 %v2830_v10  ;;  %2052 = vmatpush3.bf16.msra.mxu0 %v2899_v50 }
  0x97   : > { %2053 = vmatprep.subr.bf16.mxu0 %v2597_v0 }
  0x99   : > { %2074 = vmatpush3.bf16.msra.mxu1 %v2830_v10  ;;  %v1028_v10 = vld [vmem:[%s3181_s3 + $0x60] sm:$0xff] }
  0x9a   : > { %2075 = vmatprep.subr.bf16.mxu1 %v2843_v17  ;;  %2054 = vmatpush3.bf16.msra.mxu0 %v2905_v51 }
  0x9b   : > { %2055 = vmatprep.subr.bf16.mxu0 %v2597_v0 }
  0x9d   : > { %2076 = vmatpush3.bf16.msra.mxu1 %v2843_v17  ;;  %v1021_v17 = vld [vmem:[%s3181_s3 + $0x28] sm:$0xff] }
  0x9e   : > { %2077 = vmatprep.subr.bf16.mxu1 %v2856_v23  ;;  %2056 = vmatpush3.bf16.msra.mxu0 %v2911_v52 }
  0x9f   : > { %2057 = vmatprep.subr.bf16.mxu0 %v2597_v0 }
  0xa1   : > { %2078 = vmatpush3.bf16.msra.mxu1 %v2856_v23  ;;  %v574_v23 = vld [vmem:[%s3184_s6] sm:$0x1] }
  0xa2   : > { %2079 = vmatprep.subr.bf16.mxu1 %v2869_v29  ;;  %2058 = vmatpush3.bf16.msra.mxu0 %v2917_v57 }
  0xa3   : > { %2059 = vmatprep.subr.bf16.mxu0 %v2597_v0 }
  0xa5   : > { %2080 = vmatpush3.bf16.msra.mxu1 %v2869_v29 }
  0xa6   : > { %2060 = vmatpush3.bf16.msra.mxu0 %v2927_v62  ;;  %2113 = vmatprep.subr.mxu1 %v2938_v4 }
  0xa7   : > { %2089 = vmatprep.subr.bf16.mxu0 %v2348_v47 }
  0xa8   : > { %2082 = vmatmul.mubr.bf16.vlgmr.msra.gmra.mxu1 %v2930_v63 }
  0xa9   : > { %2085 = vmatprep.mubr.bf16.mxu1 %v2933_v1  ;;  %2062 = vmatmul.mubr.bf16.vlgmr.msra.gmra.mxu0 %v553_v46 }
  0xaa   : > { %2090 = vmatpush3.bf16.msra.mxu0 %v2348_v47  ;;  %2105 = vmatprep.mubr.bf16.mxu0 %v2880_v45 }
  0xab   : > { %2091 = vmatprep.subr.bf16.mxu0 %v2885_v48  ;;  %2114 = vmatpush3.msra.mxu1 %v2938_v4 }
  0xac   : > { %2115 = vmatprep.subr.mxu1 %v1030_v7 }
  0xad   : > { %2116 = vmatpush3.msra.mxu1 %v1030_v7 }
  0xae   : > { %2092 = vmatpush3.bf16.msra.mxu0 %v2885_v48  ;;  %2117 = vmatprep.subr.mxu1 %v1029_v9 }
  0xaf   : > { %2093 = vmatprep.subr.bf16.mxu0 %v2893_v49  ;;  %2118 = vmatpush3.msra.mxu1 %v1029_v9 }
  0xb0   : > { %2086 = vmatmul.mubr.bf16.gmra.mxu1 %v2952_v8  ;;  %2119 = vmatprep.subr.mxu1 %v1028_v10 }
  0xb1   : > { %2120 = vmatpush3.msra.mxu1 %v1028_v10 }
  0xb2   : > { %2094 = vmatpush3.bf16.msra.mxu0 %v2893_v49  ;;  %2121 = vmatprep.subr.mxu1 %v1027_v11 }
  0xb3   : > { %2095 = vmatprep.subr.bf16.mxu0 %v2899_v50  ;;  %2122 = vmatpush3.msra.mxu1 %v1027_v11 }
  0xb4   : > { %2123 = vmatprep.subr.mxu1 %v1026_v12 }
  0xb5   : > { %2124 = vmatpush3.msra.mxu1 %v1026_v12 }
  0xb6   : > { %2096 = vmatpush3.bf16.msra.mxu0 %v2899_v50  ;;  %2125 = vmatprep.subr.mxu1 %v1025_v13 }
  0xb7   : > { %2097 = vmatprep.subr.bf16.mxu0 %v2905_v51  ;;  %2126 = vmatpush3.msra.mxu1 %v1025_v13 }
  0xb8   : > { %2127 = vmatprep.subr.mxu1 %v1024_v14 }
  0xb9   : > { %2128 = vmatpush3.msra.mxu1 %v1024_v14 }
  0xba   : > { %2098 = vmatpush3.bf16.msra.mxu0 %v2905_v51  ;;  %2129 = vmatprep.subr.mxu1 %v1023_v15 }
  0xbb   : > { %2099 = vmatprep.subr.bf16.mxu0 %v2911_v52  ;;  %2130 = vmatpush3.msra.mxu1 %v1023_v15 }
  0xbc   : > { %2131 = vmatprep.subr.mxu1 %v1022_v16 }
  0xbd   : > { %2132 = vmatpush3.msra.mxu1 %v1022_v16 }
  0xbe   : > { %2100 = vmatpush3.bf16.msra.mxu0 %v2911_v52  ;;  %2133 = vmatprep.subr.mxu1 %v1021_v17 }
  0xbf   : > { %2101 = vmatprep.subr.bf16.mxu0 %v2917_v57  ;;  %2134 = vmatpush3.msra.mxu1 %v1021_v17 }
  0xc0   : > { %2135 = vmatprep.subr.mxu1 %v1020_v18 }
  0xc1   : > { %2136 = vmatpush3.msra.mxu1 %v1020_v18 }
  0xc2   : > { %2102 = vmatpush3.bf16.msra.mxu0 %v2917_v57  ;;  %2137 = vmatprep.subr.mxu1 %v1019_v19 }
  0xc3   : > { %2103 = vmatprep.subr.bf16.mxu0 %v2927_v62  ;;  %2138 = vmatpush3.msra.mxu1 %v1019_v19 }
  0xc4   : > { %2139 = vmatprep.subr.mxu1 %v1018_v20 }
  0xc5   : > { %2140 = vmatpush3.msra.mxu1 %v1018_v20 }
  0xc6   : > { %2104 = vmatpush3.bf16.msra.mxu0 %v2927_v62  ;;  %2141 = vmatprep.subr.mxu1 %v1017_v21 }
  0xc7   : > { %2157 = vmatprep.subr.mxu0 %v2597_v0  ;;  %2142 = vmatpush3.msra.mxu1 %v1017_v21 }
  0xc8   : > { %2143 = vmatprep.subr.mxu1 %v1016_v22 }
  0xc9   : > { %2106 = vmatmul.mubr.bf16.vlgmr.msra.gmra.mxu0 %v2930_v63  ;;  %2144 = vmatpush3.msra.mxu1 %v1016_v22 }
  0xca   : > { %2158 = vmatpush3.msra.mxu0 %v2938_v4  ;;  %2109 = vmatprep.mubr.bf16.mxu0 %v2933_v1 }
  0xcb   : > { %2159 = vmatprep.subr.mxu0 %v2597_v0  ;;  %2206 = vmatprep.subr.mxu1 %v2597_v0 }
  0xcc   : > { %2160 = vmatpush3.msra.mxu0 %v1030_v7 }
  0xcd   : > { %2161 = vmatprep.subr.mxu0 %v2597_v0 }
  0xce   : > { %2162 = vmatpush3.msra.mxu0 %v1029_v9 }
  0xcf   : > { %2163 = vmatprep.subr.mxu0 %v2597_v0 }
  0xd0   : > { %2164 = vmatpush3.msra.mxu0 %v1028_v10 }
  0xd1   : > { %2165 = vmatprep.subr.mxu0 %v2597_v0  ;;  %2110 = vmatmul.mubr.bf16.gmra.mxu0 %v2952_v8  ;;  %v3052_v8 = vld [vmem:[%s3182_s4] sm:$0xf] }
  0xd2   : > { %2166 = vmatpush3.msra.mxu0 %v1027_v11  ;;  %2189 = vmatprep.mubr.msk.f32.mxu0 %vm2598_vm0, %v2597_v0 }
  0xd3   : > { %2167 = vmatprep.subr.mxu0 %v2597_v0 }
  0xd4   : > { %2168 = vmatpush3.msra.mxu0 %v1026_v12 }
  0xd5   : > { %2169 = vmatprep.subr.mxu0 %v2597_v0 }
  0xd6   : > { %2170 = vmatpush3.msra.mxu0 %v1025_v13 }
  0xd7   : > { %2171 = vmatprep.subr.mxu0 %v2597_v0 }
  0xd8   : > { %2172 = vmatpush3.msra.mxu0 %v1024_v14 }
  0xd9   : > { %2173 = vmatprep.subr.mxu0 %v2597_v0 }
  0xda   : > { %2174 = vmatpush3.msra.mxu0 %v1023_v15 }
  0xdb   : > { %2175 = vmatprep.subr.mxu0 %v2597_v0 }
  0xdc   : > { %2176 = vmatpush3.msra.mxu0 %v1022_v16 }
  0xdd   : > { %2177 = vmatprep.subr.mxu0 %v2597_v0 }
  0xde   : > { %2178 = vmatpush3.msra.mxu0 %v1021_v17 }
  0xdf   : > { %2179 = vmatprep.subr.mxu0 %v2597_v0 }
  0xe0   : > { %2180 = vmatpush3.msra.mxu0 %v1020_v18 }
  0xe1   : > { %2181 = vmatprep.subr.mxu0 %v2597_v0 }
  0xe2   : > { %2182 = vmatpush3.msra.mxu0 %v1019_v19 }
  0xe3   : > { %2183 = vmatprep.subr.mxu0 %v2597_v0 }
  0xe4   : > { %2184 = vmatpush3.msra.mxu0 %v1018_v20 }
  0xe5   : > { %2185 = vmatprep.subr.mxu0 %v2597_v0 }
  0xe6   : > { %2186 = vmatpush3.msra.mxu0 %v1017_v21 }
  0xe7   : > { %2187 = vmatprep.subr.mxu0 %v2597_v0 }
  0xe8   : > { %2188 = vmatpush3.msra.mxu0 %v1016_v22 }
  0xe9   : > { %2192 = vmatprep.subr.msk.mxu0 %vm1322_vm1, %v3052_v8 }
 0x148   : > { %v657_v25 = vpop.f32.mrf.mxu0  ;;  %v762_v26 = vpop.f32.mrf.mxu1 }
 0x149   : > { %v658_v27 = vadd.f32 %v657_v25, %v574_v23  ;;  %v763_v28 = vadd.f32 %v762_v26, %v679_v24 }
 0x14a   : > { %v2043_v29 = vpop.f32.mrf.mxu1  ;;  %v2023_v30 = vpop.f32.mrf.mxu0 }
 0x14b   : > { %v1015_v31 = vmul.f32 0.17677669, %v658_v27 }
 0x14c   : > { %v765_v32 = vpop.f32.mrf.mxu1  ;;  %v660_v33 = vpop.f32.mrf.mxu0 }
 0x14d   : > { %v1150_v34 = vmul.f32 %v1015_v31, %v763_v28  ;;  %v1036_v44 = vrot.slane %v1015_v31, %v3039_v39 }
 0x14e   : > { %v2044_v35 = vpop.f32.mrf.mxu1  ;;  %v2024_v36 = vpop.f32.mrf.mxu0 }
 0x14f   : > { %2190 = vmatmul.mubr.f32.vlgmr.msra.gmra.mxu0 %v1150_v34 }
 0x150   : > { %2193 = vmatpush3.msk.msra.mxu0 %vm1322_vm1, %v3052_v8 }
 0x151   : > { %2211 = vmatprep.subr.mxu0 %v2597_v0 }
 0x168   : > { %v2083_v40 = vpop.f32.mrf.mxu1 }
 0x169   : > { %v3042_v42 = vpop.f32.mrf.mxu0  ;;  %v922_v50 = vadd.f32 %v2083_v40, %v877_v41 }
 0x16a   : > { %v913_v43 = vpop.f32.mrf.mxu1 }
 0x16b   : > { %v914_v45 = vadd.f32 %v913_v43, %v877_v41  ;;  %v2063_v46 = vpop.f32.mrf.mxu0  ;;  %v1039_v57 = vmul.f32 %v1036_v44, %v922_v50 }
 0x16c   : > { %v2084_v47 = vpop.f32.mrf.mxu1 }
 0x16d   : > { %v1037_v48 = vmul.f32 %v1036_v44, %v914_v45  ;;  %v870_v49 = vpop.f32.mrf.mxu0  ;;  %v925_v55 = vadd.f32 %v2084_v47, %v877_v41 }
 0x16e   : > { %v916_v51 = vpop.f32.mrf.mxu1 }
 0x16f   : > { %v917_v52 = vadd.f32 %v916_v51, %v877_v41  ;;  %2145 = vmatprep.mubr.f32.mxu1 %v1037_v48  ;;  %v2064_v53 = vpop.f32.mrf.mxu0  ;;  %v1040_v61 = vmul.f32 %v1036_v44, %v925_v55 }
 0x170   : > { %v2087_v54 = vpop.f32.mrf.mxu1 }
 0x171   : > { %v1038_v56 = vmul.f32 %v1036_v44, %v917_v52  ;;  %v938_v63 = vadd.f32 %v2087_v54, %v877_v41 }
 0x172   : > { %v929_v58 = vpop.f32.mrf.mxu1 }
 0x173   : > { %v930_v59 = vadd.f32 %v929_v58, %v877_v41  ;;  %2146 = vmatmul.mubr.f32.vlgmr.msra.gmra.mxu1 %v1038_v56  ;;  %v1043_v5 = vmul.f32 %v1036_v44, %v938_v63 }
 0x174   : > { %v2088_v60 = vpop.f32.mrf.mxu1  ;;  %2148 = vmatprep.mubr.f32.mxu1 %v1039_v57  ;;  %2207 = vmatpush3.msk.msra.mxu1 %vm1322_vm1, %v3052_v8 }
 0x175   : > { %v1041_v62 = vmul.f32 %v1036_v44, %v930_v59  ;;  %v941_v3 = vadd.f32 %v2088_v60, %v877_v41  ;;  %2216 = vmatprep.subr.bf16.mxu1 %v2597_v0 }
 0x176   : > { %v932_v1 = vpop.f32.mrf.mxu1 }
 0x177   : > { %v933_v2 = vadd.f32 %v932_v1, %v877_v41  ;;  %2149 = vmatmul.mubr.f32.gmra.mxu1 %v1040_v61  ;;  %v1044_v6 = vmul.f32 %v1036_v44, %v941_v3 }
 0x178   : > { %2151 = vmatprep.mubr.f32.mxu1 %v1041_v62 }
 0x179   : > { %v1042_v4 = vmul.f32 %v1036_v44, %v933_v2 }
 0x17b   : > { %2152 = vmatmul.mubr.f32.gmra.mxu1 %v1042_v4 }
 0x17c   : > { %2154 = vmatprep.mubr.f32.mxu1 %v1043_v5 }
 0x17f   : > { %2155 = vmatmul.mubr.f32.gmra.mxu1 %v1044_v6 }
 0x180   : > { %2208 = vmatprep.mubr.msk.f32.mxu1 %vm2598_vm0, %v2597_v0 }
 0x189   : > { %v3047_v7 = vpop.f32.mrf.mxu0 }
 0x18b   : > { %v3058_v9 = vpop.f32.mrf.mxu0 }
 0x18d   : > { %v3064_v10 = vpop.f32.mrf.mxu0 }
 0x18f   : > { %v3066_v11 = vpop.f32.mrf.mxu0 }
 0x191   : > { %v3068_v12 = vpop.f32.mrf.mxu0 }
 0x193   : > { %v3070_v13 = vpop.f32.mrf.mxu0 }
 0x195   : > { %v3072_v14 = vpop.f32.mrf.mxu0 }
 0x197   : > { %v3074_v15 = vpop.f32.mrf.mxu0 }
 0x20f   : > { %v1217_v16 = vpop.f32.mrf.mxu0 }
 0x211   : > { %v2191_v17 = vpop.f32.mrf.mxu0 }
 0x233   : > { %v2147_v18 = vpop.f32.mrf.mxu1 }
 0x234   : > { %v1223_v31 = vsel %vm1221_vm2, %v2147_v18, -inf }
 0x235   : > { %v1111_v19 = vpop.f32.mrf.mxu1 }
 0x236   : > { %v1222_v26 = vsel %vm1221_vm2, %v1111_v19, -inf }
 0x237   : > { %v2150_v20 = vpop.f32.mrf.mxu1 }
 0x238   : > { %v1225_v32 = vsel %vm1221_vm2, %v2150_v20, -inf }
 0x239   : > { %v1121_v21 = vpop.f32.mrf.mxu1 }
 0x23a   : > { %v1224_v33 = vsel %vm1221_vm2, %v1121_v21, -inf }
 0x23b   : > { %v2153_v22 = vpop.f32.mrf.mxu1 }
 0x23c   : > { %v1228_v27 = vsel %vm1221_vm2, %v2153_v22, -inf }
 0x23d   : > { %v1131_v23 = vpop.f32.mrf.mxu1  ;;  %v1229_v35 = vmax.f32 %v1223_v31, %v1228_v27 }
 0x23e   : > { %v1226_v24 = vsel %vm1221_vm2, %v1131_v23, -inf }
 0x23f   : > { %v2156_v25 = vpop.f32.mrf.mxu1  ;;  %v1227_v29 = vmax.f32 %v1222_v26, %v1226_v24 }
 0x240   : > { %v1232_v28 = vsel %vm1221_vm2, %v2156_v25, -inf }
 0x241   : > { %v1141_v30 = vpop.f32.mrf.mxu1  ;;  %v1233_v36 = vmax.f32 %v1225_v32, %v1232_v28  ;;  %v1234_v38 = vmax.f32 %v1227_v29, %v1229_v35 }
 0x242   : > { %v1230_v34 = vsel %vm1221_vm2, %v1141_v30, -inf }
 0x243   : > { %v1231_v37 = vmax.f32 %v1224_v33, %v1230_v34 }
 0x245   : > { %v1235_v40 = vmax.f32 %v1231_v37, %v1233_v36 }
 0x247   : > { %v1236_v41 = vmax.f32 %v1234_v38, %v1235_v40 }
 0x249   : > { %v1237_v43 = vrot.slane %v1236_v41, 4 }
 0x24b   : > { %v1238_v44 = vmax.f32 %v1236_v41, %v1237_v43 }
 0x24d   : > { %v1239_v45 = vrot.slane %v1238_v44, 2 }
 0x24f   : > { %v1240_v46 = vmax.f32 %v1238_v44, %v1239_v45 }
 0x251   : > { %v1241_v47 = vrot.slane %v1240_v46, 1 }
 0x253   : > { %v1242_v48 = vmax.f32 %v1240_v46, %v1241_v47 }
 0x255   : > { %v1243_v49 = vmax.f32 %v1242_v48, %v1217_v16  ;;  %v2356_v48 = vld [vmem:[#allocation10 + $0x38] sm:$0xff]  }
 0x257   : > { %v1247_v50 = vrot.slane %v1243_v49, %v3039_v39  ;;  %v1272_v61 = vsub.f32 %v1217_v16, %v1243_v49  ;;  %v2357_v49 = vld [vmem:[#allocation10 + $0x30] sm:$0xff]  }
 0x259   : > { %v1248_v51 = vsub.f32 %v1111_v19, %v1247_v50  ;;  %v1249_v52 = vsub.f32 %v2147_v18, %v1247_v50  ;;  %v1250_v53 = vsub.f32 %v1121_v21, %v1247_v50  ;;  %v1251_v54 = vsub.f32 %v2150_v20, %v1247_v50 }
 0x25a   : > { %v1252_v55 = vsub.f32 %v1131_v23, %v1247_v50  ;;  %v1253_v59 = vsub.f32 %v2153_v22, %v1247_v50  ;;  %v1254_v62 = vsub.f32 %v1141_v30, %v1247_v50  ;;  %v1255_v1 = vsub.f32 %v2156_v25, %v1247_v50  ;;  %v2358_v50 = vld [vmem:[#allocation10 + $0x28] sm:$0xff]  }
 0x25b   : > { %v1256_v56 = vmul.f32 1.442695, %v1248_v51  ;;  %v1258_v57 = vmul.f32 1.442695, %v1249_v52  ;;  %v1260_v58 = vmul.f32 1.442695, %v1250_v53 }
 0x25c   : > { %v1262_v60 = vmul.f32 1.442695, %v1251_v54  ;;  %v1264_v63 = vmul.f32 1.442695, %v1252_v55  ;;  %v1266_v2 = vmul.f32 1.442695, %v1253_v59 }
 0x25d   : > { %2364 = vpow2.f32 %v1256_v56  ;;  %v1273_v3 = vmul.f32 1.442695, %v1272_v61  ;;  %v1268_v4 = vmul.f32 1.442695, %v1254_v62  ;;  %v1270_v5 = vmul.f32 1.442695, %v1255_v1 }
 0x25e   : > { %2366 = vpow2.f32 %v1258_v57  ;;  %v2359_v51 = vld [vmem:[#allocation10 + $0x20] sm:$0xff]   ;;  %v2360_v52 = vld [vmem:[#allocation10 + $0x18] sm:$0xff]   ;;  %v2361_v53 = vld [vmem:[#allocation10 + $0x10] sm:$0xff]  }
 0x25f   : > { %2368 = vpow2.f32 %v1260_v58  ;;  %v2362_v54 = vld [vmem:[#allocation10 + $0x8] sm:$0xff]   ;;  %v2363_v55 = vld [vmem:[#allocation10] sm:$0xff]  }
 0x260   : > { %2370 = vpow2.f32 %v1262_v60  ;;  %v784_v56 = vld [vmem:[%s3188_s10] sm:$0x1] }
 0x261   : > { %2372 = vpow2.f32 %v1264_v63  ;;  %v948_v57 = vrot.slane %v784_v56, %v3039_v39 }
 0x262   : > { %2374 = vpow2.f32 %v1266_v2 }
 0x263   : > { %2376 = vpow2.f32 %v1273_v3  ;;  %v985_v59 = vadd.f32 %v3058_v9, %v948_v57  ;;  %v988_v60 = vadd.f32 %v3066_v11, %v948_v57  ;;  %v993_v2 = vadd.f32 %v3047_v7, %v948_v57 }
 0x264   : > { %2378 = vpow2.f32 %v1268_v4  ;;  %v996_v4 = vadd.f32 %v3064_v10, %v948_v57  ;;  %v1001_v39 = vadd.f32 %v3070_v13, %v948_v57  ;;  %v1004_v11 = vadd.f32 %v3074_v15, %v948_v57 }
 0x265   : > { %2380 = vpow2.f32 %v1270_v5  ;;  %v1009_v7 = vadd.f32 %v3068_v12, %v948_v57  ;;  %v1012_v10 = vadd.f32 %v3072_v14, %v948_v57 }
 0x26a   : > { %v2365_v6 = vpop.eup %2364 }
 0x26b   : > { %v2367_v17 = vpop.eup %2366  ;;  %v1275_v18 = vsel %vm1221_vm2, %v2365_v6, 0.0  ;;  %2194 = vmatprep.mubr.msk.f32.mxu0 %vm1221_vm2, %v2365_v6 }
 0x26c   : > { %v2369_v16 = vpop.eup %2368  ;;  %v1276_v19 = vsel %vm1221_vm2, %v2367_v17, 0.0  ;;  %2195 = vmatmul.mubr.msk.f32.vlgmr.msra.gmra.mxu0 %vm1221_vm2, %v2367_v17 }
 0x26d   : > { %v2371_v20 = vpop.eup %2370  ;;  %v1277_v21 = vadd.f32 %v1276_v19, %v1275_v18  ;;  %2197 = vmatprep.mubr.msk.f32.mxu0 %vm1221_vm2, %v2369_v16  ;;  %2212 = vmatpush3.msk.msra.mxu0 %vm1322_vm1, %v3052_v8  ;;  %v1278_v22 = vsel %vm1221_vm2, %v2369_v16, 0.0 }
 0x26e   : > { %v2373_v23 = vpop.eup %2372  ;;  %v1280_v25 = vsel %vm1221_vm2, %v2371_v20, 0.0 }
 0x26f   : > { %v1279_v24 = vadd.f32 %v1278_v22, %v1277_v21  ;;  %v2375_v26 = vpop.eup %2374  ;;  %v1282_v29 = vsel %vm1221_vm2, %v2373_v23, 0.0 }
 0x270   : > { %2198 = vmatmul.mubr.msk.f32.gmra.mxu0 %vm1221_vm2, %v2371_v20  ;;  %v2377_v28 = vpop.eup %2376  ;;  %v1284_v8 = vsel %vm1221_vm2, %v2375_v26, 0.0 }
 0x271   : > { %v1281_v27 = vadd.f32 %v1280_v25, %v1279_v24  ;;  %2200 = vmatprep.mubr.msk.f32.mxu0 %vm1221_vm2, %v2373_v23  ;;  %v2379_v30 = vpop.eup %2378  ;;  %2209 = vmatmul.mubr.msk.f32.vlgmr.msra.gmra.mxu1 %vm1221_vm2, %v2377_v28 }
 0x272   : > { %2232 = vmatprep.mubr.msk.bf16.mxu1 %vm2598_vm0, %v2597_v0  ;;  %v2381_v32 = vpop.eup %2380  ;;  %v1286_v34 = vsel %vm1221_vm2, %v2379_v30, 0.0  ;;  %2217 = vmatpush3.bf16.msra.mxu1 %v2356_v48 }
 0x273   : > { %v1283_v31 = vadd.f32 %v1282_v29, %v1281_v27  ;;  %v1288_v36 = vsel %vm1221_vm2, %v2381_v32, 0.0  ;;  %2218 = vmatprep.subr.bf16.mxu1 %v2597_v0 }
 0x274   : > { %2201 = vmatmul.mubr.msk.f32.gmra.mxu0 %vm1221_vm2, %v2375_v26 }
 0x275   : > { %v1285_v33 = vadd.f32 %v1284_v8, %v1283_v31  ;;  %2203 = vmatprep.mubr.msk.f32.mxu0 %vm1221_vm2, %v2379_v30 }
 0x276   : > { %2219 = vmatpush3.bf16.msra.mxu1 %v2357_v49 }
 0x277   : > { %v1287_v35 = vadd.f32 %v1286_v34, %v1285_v33  ;;  %2220 = vmatprep.subr.bf16.mxu1 %v2597_v0 }
 0x278   : > { %2204 = vmatmul.mubr.msk.f32.gmra.mxu0 %vm1221_vm2, %v2381_v32  ;;  %v868_v32 = vadd.f32 %v3042_v42, %v784_v56 }
 0x279   : > { %v1289_v37 = vadd.f32 %v1288_v36, %v1287_v35  ;;  %2213 = vmatprep.mubr.msk.f32.mxu0 %vm2598_vm0, %v2597_v0 }
 0x27a   : > { %2221 = vmatpush3.bf16.msra.mxu1 %v2358_v50 }
 0x27b   : > { %v1290_v38 = vrot.slane %v1289_v37, 4  ;;  %2222 = vmatprep.subr.bf16.mxu1 %v2597_v0 }
 0x27d   : > { %v1291_v40 = vadd.f32 %v1290_v38, %v1289_v37 }
 0x27e   : > { %2223 = vmatpush3.bf16.msra.mxu1 %v2359_v51 }
 0x27f   : > { %v1292_v41 = vrot.slane %v1291_v40, 2  ;;  %2224 = vmatprep.subr.bf16.mxu1 %v2597_v0 }
 0x281   : > { %v1293_v43 = vadd.f32 %v1292_v41, %v1291_v40  ;;  %v1618_v40 = vld [vmem:[%s3190_s12] sm:$0x1] }
 0x282   : > { %2225 = vmatpush3.bf16.msra.mxu1 %v2360_v52 }
 0x283   : > { %v1294_v44 = vrot.slane %v1293_v43, 1  ;;  %2226 = vmatprep.subr.bf16.mxu1 %v2597_v0 }
 0x285   : > { %v1295_v45 = vadd.f32 %v1294_v44, %v1293_v43 }
 0x286   : > { %2227 = vmatpush3.bf16.msra.mxu1 %v2361_v53 }
 0x287   : > { %v1296_v46 = vadd.f32 %v2377_v28, %v1295_v45  ;;  %2228 = vmatprep.subr.bf16.mxu1 %v2597_v0 }
 0x289   : > { %2382 = vrcp.f32 %v1296_v46 }
 0x28a   : > { %2229 = vmatpush3.bf16.msra.mxu1 %v2362_v54 }
 0x28b   : > { %2230 = vmatprep.subr.bf16.mxu1 %v2597_v0 }
 0x28e   : > { %2231 = vmatpush3.bf16.msra.mxu1 %v2363_v55 }
 0x296   : > { %v2383_v47 = vpop.eup %2382 }
 0x297   : > { %2214 = vmatmul.mubr.msk.f32.vlgmr.msra.gmra.mxu0 %vm1221_vm2, %v2383_v47 }
 0x32c   : > { %v2196_v58 = vpop.f32.mrf.mxu0 }
 0x32d   : > { %v1578_v62 = vmul.f32 %v2196_v58, %v988_v60 }
 0x32e   : > { %v1392_v61 = vpop.f32.mrf.mxu0 }
 0x32f   : > { %v1577_v63 = vmul.f32 %v1392_v61, %v985_v59 }
 0x330   : > { %v2199_v1 = vpop.f32.mrf.mxu0 }
 0x331   : > { %v1585_v3 = vadd.f32 %v1578_v62, %v1577_v63  ;;  %v1500_v5 = vpop.f32.mrf.mxu1  ;;  %v1580_v16 = vmul.f32 %v2199_v1, %v996_v4 }
 0x332   : > { %v1402_v0 = vpop.f32.mrf.mxu0  ;;  %v1598_v12 = vmul.f32 %v1500_v5, %v868_v32 }
 0x333   : > { %v1579_v6 = vmul.f32 %v1402_v0, %v993_v2  ;;  %v2210_v18 = vpop.f32.mrf.mxu1 }
 0x334   : > { %v2202_v17 = vpop.f32.mrf.mxu0 }
 0x335   : > { %v1586_v9 = vadd.f32 %v1585_v3, %v1579_v6  ;;  %v1582_v23 = vmul.f32 %v2202_v17, %v1004_v11 }
 0x336   : > { %v1412_v19 = vpop.f32.mrf.mxu0 }
 0x337   : > { %v1581_v20 = vmul.f32 %v1412_v19, %v1001_v39  ;;  %v1587_v21 = vadd.f32 %v1586_v9, %v1580_v16 }
 0x338   : > { %v2205_v22 = vpop.f32.mrf.mxu0 }
 0x339   : > { %v1588_v24 = vadd.f32 %v1587_v21, %v1581_v20  ;;  %v1584_v28 = vmul.f32 %v2205_v22, %v1012_v10 }
 0x33a   : > { %v1422_v25 = vpop.f32.mrf.mxu0 }
 0x33b   : > { %v1583_v26 = vmul.f32 %v1422_v25, %v1009_v7  ;;  %v1589_v27 = vadd.f32 %v1588_v24, %v1582_v23 }
 0x33d   : > { %v1590_v13 = vadd.f32 %v1589_v27, %v1583_v26 }
 0x33f   : > { %v1591_v29 = vadd.f32 %v1590_v13, %v1584_v28 }
 0x341   : > { %v1592_v30 = vrot.slane %v1591_v29, 4 }
 0x343   : > { %v1593_v31 = vadd.f32 %v1592_v30, %v1591_v29 }
 0x345   : > { %v1594_v15 = vrot.slane %v1593_v31, 2 }
 0x347   : > { %v1595_v8 = vadd.f32 %v1594_v15, %v1593_v31 }
 0x349   : > { %v1596_v33 = vrot.slane %v1595_v8, 1 }
 0x34b   : > { %v1597_v34 = vadd.f32 %v1596_v33, %v1595_v8 }
 0x34d   : > { %v1599_v35 = vadd.f32 %v1598_v12, %v1597_v34 }
 0x357   : > { %v1573_v36 = vpop.f32.mrf.mxu0 }
 0x358   : > { %v1600_v37 = vmul.f32 %v1599_v35, %v1573_v36 }
 0x359   : > { %v2215_v14 = vpop.f32.mrf.mxu0 }
 0x35a   : > { %v1601_v38 = vpack.c.bf16 %v1600_v37, %v1600_v37 }
 0x35c   : > { %2233 = vmatmul.mubr.bf16.vlgmr.msra.gmra.mxu1 %v1601_v38 }
 0x41c   : > { %v1701_v41 = vpop.f32.mrf.mxu1 }
 0x41d   : > { %v1702_v42 = vadd.f32 %v1701_v41, %v1618_v40 }
 0x41e   : > { %v2234_v43 = vpop.f32.mrf.mxu1 }
 0x41f   : > { %1707 = vst [vmem:[%s505_s16] sm:$0x1] %v1702_v42 }
 0x420   : > { %v1704_v44 = vpop.f32.mrf.mxu1 }
 0x421   : > { %2527 = shalt.err (!%p2524_p0)
}
 0x422   : > { %s2528_s25 = scalar_lea.hbm %s3137_s19, 16  ;;  %s2532_s27 = scalar_lea.hbm %s3191_s13, 32 }
 0x423   : > { %p2529_p3 = scmp.ne.s32.totalorder %s3137_s19, %s2528_s25  ;;  %p2533_p12 = scmp.lt.s32.totalorder %s3137_s19, %s3191_s13 }
 0x424   : > { %p2534_p10 = scmp.lt.s32.totalorder %s2532_s27, %s2528_s25 }
 0x425   : > { %p2530_p1 = pnand %p2529_p3, %p2708_p5 }
 0x426   : > { %p2535_p4 = por %p2534_p10, %p2533_p12 }
 0x427   : > { %p2531_p2 = pneg %p2530_p1 }
 0x429   : > { %p2536_p9 = pnand %p2535_p4, %p2531_p2 }
 0x42b   : > { %2539 = shalt.err (!%p2536_p9)
}
 0x42c   : > { %2256 = dma.vmem_to_hbm [thread:$0]  (%p2708_p5), %s3139_s14, 16, %s3137_s19, %s1709_s17   ;;  %v2235_v45 = vpop.f32.mrf.mxu1 }
 0x42d PF: > { %s3222_s24 = sld [smem:[#allocation16_spill]]  ;;  %p2288_p8 = scmp.ge.s32.totalorder %s2586_s28, 2 }
 0x42f   : > { %p2275_p7 = pnand %p2288_p8, %p2712_p6 }
 0x431   : > { %p2276_p11 = pneg %p2275_p7 }
 0x433   : > { %s1733_s20 = sand.u32 1, %s3222_s24  }
 0x434   : > { %s1734_s29 = scalar_lea.sflag [#allocation4], %s1733_s20 }
 0x435   : > { %2569 = dma.done.wait (%p2276_p11), %s1734_s29, 16  }
 0x436   : > { %2571 = vsyncadd (%p2276_p11), %s1734_s29, 4294967280  ;;  %s3224_s28 = sld [smem:[#allocation18_spill]]  ;;  %s3227_s25 = smov %s2578_s26 }
 0x437   : > { %s3225_s23 = sld [smem:[#allocation17_spill]] }
 0x438   : > { %s3226_s27 = sld [smem:[#allocation19_spill]] }
 0x43c   : > { %p26_p13 = scmp.ge.s32.totalorder %s3224_s28, 4  }
 0x43d   : > { %s3228_s26 = smov %s3225_s23 }
 0x43e   :  { %28 = sbr.rel (!%p26_p13) target bundleno = 8 (0x8), region = 128 }
 0x443   :  { %1738 = vsyncpa [#allocation3], 1 }
 0x444   :  { %1740 = vsyncpa [#allocation3 + $0x1], 1 }
 0x445   :  { %1741 = vsyncpa [#allocation6], 1 }
 0x446   :  { %1742 = vsyncpa [#allocation9], 1 }
 0x447   :  { %1743 = vsyncpa [#allocation4], 1 }
 0x448   :  { %1745 = vsyncpa [#allocation4 + $0x1], 1 }

</bundles_post_ra>
